<compile_context>
chip_gen: v7x
topology: tpu7x:2x2x1
jax: 0.10.0
libtpu: 0.0.40
codegen_flags: <defaults>
</compile_context>

<pallas_src>
import numpy as np
import jax
import jax.numpy as jnp
from jax import lax
from jax.experimental import pallas as pl
from jax.experimental.pallas import tpu as pltpu


# ----------------------------------------------------------------------------- helpers

def make_kernel_np(k):
    """Mirror of make_kernel() in the PyTorch module (numpy, float32)."""
    k = np.asarray(k, dtype=np.float32)
    if k.ndim == 1:
        k = k[None, :] * k[:, None]
    k = k / k.sum()
    return k


def _lane(n):
    return -(-n // 128) * 128


def _sub(n):
    return -(-n // 8) * 8


def _divisors_desc(n):
    return [d for d in range(n, 0, -1) if n % d == 0]


def _vmem_capacity_bytes():
    """Per-core VMEM capacity; conservative 64 MiB fallback (v7x) if the query fails."""
    try:
        info = pltpu.get_tpu_info()
        cap = getattr(info, "vmem_capacity_bytes", None)
        if cap:
            return int(cap)
    except Exception:
        pass
    return 64 * 1024 * 1024


def _pad_value(x, ph0, ph1, pw0, pw1):
    """Zero-pad a (BC, H, W) value along H (sublane) and W (lane) via concatenation.

    Done in value-land so no explicit zero-fill / VMEM->VMEM copy store passes are emitted.
    """
    bc, h, w = x.shape
    if ph0 or ph1:
        parts = []
        if ph0:
            parts.append(jnp.zeros((bc, ph0, w), x.dtype))
        parts.append(x)
        if ph1:
            parts.append(jnp.zeros((bc, ph1, w), x.dtype))
        x = jnp.concatenate(parts, axis=1)
        h = h + ph0 + ph1
    if pw0 or pw1:
        parts = []
        if pw0:
            parts.append(jnp.zeros((bc, h, pw0), x.dtype))
        parts.append(x)
        if pw1:
            parts.append(jnp.zeros((bc, h, pw1), x.dtype))
        x = jnp.concatenate(parts, axis=2)
    return x


def _fir_axis(x, taps, axis, out_len):
    """1-D FIR along `axis`; taps sharing a coefficient are summed first, multiplied once."""
    groups = {}
    for j, t in enumerate(taps):
        t = float(t)
        if t == 0.0:
            continue
        groups.setdefault(t, []).append(j)
    acc = None
    for coef, idxs in groups.items():
        s = None
        for j in idxs:
            sl = lax.slice_in_dim(x, j, j + out_len, axis=axis)
            s = sl if s is None else s + sl
        term = s if coef == 1.0 else coef * s
        acc = term if acc is None else acc + term
    if acc is None:
        shp = list(x.shape)
        shp[axis] = out_len
        acc = jnp.zeros(shp, x.dtype)
    return acc


def _fir_2d(x, k2, out_h, out_w):
    """Full kh*kw tap unroll (non-separable kernels), with equal-coefficient folding."""
    kh, kw = k2.shape
    groups = {}
    for i in range(kh):
        for j in range(kw):
            v = float(k2[i, j])
            if v == 0.0:
                continue
            groups.setdefault(v, []).append((i, j))
    acc = None
    for coef, idxs in groups.items():
        s = None
        for (i, j) in idxs:
            sl = x[:, i:i + out_h, j:j + out_w]
            s = sl if s is None else s + sl
        term = s if coef == 1.0 else coef * s
        acc = term if acc is None else acc + term
    if acc is None:
        acc = jnp.zeros((x.shape[0], out_h, out_w), x.dtype)
    return acc


# ------------------------------------------------------------------------ kernel builders

def _build_untiled_kernel(separable, col_taps, row_taps, k2,
                          pad0, pad1, H, W, Ho, Wo):
    """Full-spatial-extent kernel: one channel block per grid step (BlockSpec pipelined)."""
    ch0, ch1 = max(-pad0, 0), max(-pad1, 0)   # crops (negative padding), same for H and W
    ph0, ph1 = max(pad0, 0), max(pad1, 0)

    def kernel(x_ref, o_ref):
        x = x_ref[...]                                      # (BC, H, W)
        if ch0 or ch1:
            x = x[:, ch0:H - ch1, ch0:W - ch1]
        xp = _pad_value(x.astype(jnp.float32), ph0, ph1, ph0, ph1)   # (BC, Hp, Wp)
        if separable:
            out = _fir_axis(_fir_axis(xp, row_taps, 2, Wo), col_taps, 1, Ho)
        else:
            out = _fir_2d(xp, k2, Ho, Wo)
        o_ref[...] = out.astype(o_ref.dtype)

    return kernel


def _build_tiled_kernel(separable, col_taps, row_taps, k2,
                        pad0, pad1, H, W, Wo, BC, TH, THp):
    """H-tiled kernel: input stays in HBM (pl.ANY); each step DMAs its halo'd row window.

    Requires pad0, pad1 >= 0, TH % 8 == 0, TH | Ho, n_h >= 2, TH >= max(pad0, pad1),
    THp - pad0 <= H, THp - pad1 <= H (all enforced by the wrapper).
    """
    def kernel(x_any, o_ref, xrows, dma_sem):
        c = pl.program_id(0)
        t = pl.program_id(1)
        n_h = pl.num_programs(1)
        c0 = c * BC

        def copy_rows(src_row0, n_rows, dst_row0):
            cp = pltpu.make_async_copy(
                x_any.at[pl.ds(c0, BC), pl.ds(src_row0, n_rows), :],
                xrows.at[:, pl.ds(dst_row0, n_rows), :],
                dma_sem)
            cp.start()
            cp.wait()

        # xrows row q must hold padded row (t*TH + q) == original row (t*TH + q - pad0),
        # or zero if that original row is out of [0, H).
        @pl.when(t == 0)
        def _():
            if pad0 > 0:
                xrows[:, 0:pad0, :] = jnp.zeros((BC, pad0, W), xrows.dtype)
            copy_rows(0, THp - pad0, pad0)

        @pl.when(t == n_h - 1)
        def _():
            if pad1 > 0:
                xrows[:, THp - pad1:THp, :] = jnp.zeros((BC, pad1, W), xrows.dtype)
            copy_rows(H - (THp - pad1), THp - pad1, 0)

        @pl.when(jnp.logical_and(t > 0, t < n_h - 1))
        def _():
            copy_rows(t * TH - pad0, THp, 0)

        xp = _pad_value(xrows[...].astype(jnp.float32), 0, 0, pad0, pad1)  # (BC, THp, Wp)
        if separable:
            out = _fir_axis(_fir_axis(xp, row_taps, 2, Wo), col_taps, 1, TH)
        else:
            out = _fir_2d(xp, k2, TH, Wo)
        o_ref[...] = out.astype(o_ref.dtype)

    return kernel


# ------------------------------------------------------------------------------- module

class BlurPallas:
    """JAX/Pallas TPU equivalent of the PyTorch Blur module (upfirdn2d with up=down=1)."""

    def __init__(self, kernel, pad, upsample_factor=1):
        k_in = np.asarray(kernel, dtype=np.float32)
        k2 = make_kernel_np(kernel)
        if upsample_factor > 1:
            k2 = k2 * (upsample_factor ** 2)
        # upfirdn2d convolves with flip(kernel); pre-flip so the in-kernel op is a plain
        # cross-correlation with static taps.
        self.kernel2d = np.ascontiguousarray(k2[::-1, ::-1])
        self.pad = (int(pad[0]), int(pad[1]))               # applied to both H and W
        self.separable = (k_in.ndim == 1)
        if self.separable:
            base = np.ascontiguousarray(k_in[::-1]) / float(k_in.sum())
            self.row_taps = [float(v) for v in base]                               # W pass
            self.col_taps = [float(v) * float(upsample_factor ** 2) for v in base]  # H pass
            assert np.allclose(np.outer(self.col_taps, self.row_taps),
                               self.kernel2d, atol=1e-6)
        else:
            self.row_taps = None
            self.col_taps = None

    def __call__(self, x, *, h_tile=None):
        # x: (N, C, H, W) NCHW, matching PyTorch.  No relayout glue is emitted: both
        # reshapes below are metadata-only.
        N, C, H, W = x.shape
        pad0, pad1 = self.pad
        kh, kw = self.kernel2d.shape

        Hp, Wp = H + pad0 + pad1, W + pad0 + pad1
        Ho, Wo = Hp - kh + 1, Wp - kw + 1
        assert Ho > 0 and Wo > 0, "blur output would be empty"
        assert H - max(-pad0, 0) - max(-pad1, 0) > 0, "negative padding crops away all rows"
        assert W - max(-pad0, 0) - max(-pad1, 0) > 0, "negative padding crops away all cols"

        NC = N * C
        xr = x.reshape(NC, H, W)
        itemsize = int(np.dtype(x.dtype).itemsize)

        vmem_cap = _vmem_capacity_bytes()
        budget = int(vmem_cap * 0.35)         # per-block footprint target (v7x ~22MiB, v5e/v6e ~45MiB)
        vmem_limit = int(vmem_cap * 0.75)

        # per-channel VMEM footprints, with (8,128) layout padding accounted for
        def untiled_per_ch():
            b = 2 * _sub(H) * _lane(W) * itemsize           # double-buffered input block
            b += 2 * _sub(Ho) * _lane(Wo) * itemsize        # double-buffered output block
            b += _sub(Hp) * _lane(Wp) * 4                   # padded f32 temp
            b += _sub(Hp) * _lane(Wo) * 4                   # mid / acc f32 temp
            return b

        def tiled_per_ch(th, thp):
            b = _sub(thp) * _lane(W) * itemsize             # halo'd row scratch
            b += 2 * _sub(th) * _lane(Wo) * itemsize        # double-buffered output block
            b += _sub(thp) * _lane(Wp) * 4                  # padded f32 temp
            b += _sub(thp) * _lane(Wo) * 4                  # mid / acc f32 temp
            return b

        divs = _divisors_desc(NC)
        cap = NC // 2 if NC >= 16 else NC                   # keep >=2 grid steps for v7x megacore
        per_ch = untiled_per_ch()
        bc_untiled = next((d for d in divs if d <= cap and d * per_ch <= budget), None)

        def pick_tiled(th_cands):
            fallback = None
            for th in th_cands:
                if th <= 0 or Ho % th != 0 or Ho // th < 2 or th % 8 != 0:
                    continue
                thp = th + kh - 1
                if th < max(pad0, pad1) or thp - pad0 > H or thp - pad1 > H:
                    continue
                pc = tiled_per_ch(th, thp)
                bc = next((d for d in divs if d * pc <= budget), None)
                if bc is None:
                    continue
                if bc >= min(8, NC):
                    return bc, th
                if fallback is None:
                    fallback = (bc, th)
            return fallback

        use_tiled, BC, TH = False, None, None
        pads_nonneg = (pad0 >= 0) and (pad1 >= 0)
        want_tile = (h_tile is not None) or (bc_untiled is None) \
            or (bc_untiled < min(8, NC))
        if want_tile and pads_nonneg:
            cands = [int(h_tile)] if h_tile is not None else \
                [t for t in _divisors_desc(Ho) if t < Ho]
            pick = pick_tiled(cands)
            if pick is not None:
                BC, TH = pick
                use_tiled = True
            elif h_tile is not None:
                raise ValueError(f"h_tile={h_tile} is not a valid row tile for this input")

        if not use_tiled:
            if bc_untiled is None:
                # TODO(synk): add W-tiling / ragged-H tiling for inputs too large even for
                # the halo'd H-tiling scheme.
                raise ValueError("Blur input too large for the available VMEM tiling options")
            BC = bc_untiled

        ntaps = (kh + kw) if self.separable else int(np.count_nonzero(self.kernel2d))
        cost = pl.CostEstimate(
            flops=2 * ntaps * Ho * Wo * NC,
            transcendentals=0,
            bytes_accessed=(H * W + Ho * Wo) * NC * itemsize)

        if use_tiled:
            THp = TH + kh - 1
            kfn = _build_tiled_kernel(self.separable, self.col_taps, self.row_taps,
                                      self.kernel2d, pad0, pad1, H, W, Wo, BC, TH, THp)
            out = pl.pallas_call(
                kfn,
                out_shape=jax.ShapeDtypeStruct((NC, Ho, Wo), x.dtype),
                grid_spec=pltpu.PrefetchScalarGridSpec(
                    num_scalar_prefetch=0,
                    grid=(NC // BC, Ho // TH),
                    in_specs=[pl.BlockSpec(memory_space=pl.ANY)],
                    out_specs=pl.BlockSpec((BC, TH, Wo), lambda c, t: (c, t, 0)),
                    scratch_shapes=[pltpu.VMEM((BC, THp, W), x.dtype),
                                    pltpu.SemaphoreType.DMA(())]),
                compiler_params=pltpu.CompilerParams(
                    dimension_semantics=("parallel", "parallel"),
                    vmem_limit_bytes=vmem_limit),
                cost_estimate=cost,
            )(xr)
        else:
            kfn = _build_untiled_kernel(self.separable, self.col_taps, self.row_taps,
                                        self.kernel2d, pad0, pad1, H, W, Ho, Wo)
            out = pl.pallas_call(
                kfn,
                out_shape=jax.ShapeDtypeStruct((NC, Ho, Wo), x.dtype),
                grid_spec=pltpu.PrefetchScalarGridSpec(
                    num_scalar_prefetch=0,
                    grid=(NC // BC,),
                    in_specs=[pl.BlockSpec((BC, H, W), lambda c: (c, 0, 0))],
                    out_specs=pl.BlockSpec((BC, Ho, Wo), lambda c: (c, 0, 0))),
                compiler_params=pltpu.CompilerParams(
                    dimension_semantics=("parallel",),
                    vmem_limit_bytes=vmem_limit),
                cost_estimate=cost,
            )(xr)

        return out.reshape(N, C, Ho, Wo)


# ------------------------------------------------------------------------------ reference

def _reference_blur(x, kernel, pad, upsample_factor=1):
    """Pure-JAX reference (depthwise conv) of upfirdn2d(x, make_kernel(kernel), pad=pad)."""
    k = make_kernel_np(kernel)
    if upsample_factor > 1:
        k = k * (upsample_factor ** 2)
    kf = jnp.asarray(np.ascontiguousarray(k[::-1, ::-1]))   # conv with k == corr with flip(k)
    N, C, H, W = x.shape
    pad0, pad1 = pad
    p0, p1 = max(pad0, 0), max(pad1, 0)
    c0, c1 = max(-pad0, 0), max(-pad1, 0)
    xf = x.reshape(N * C, 1, H, W)
    xf = jnp.pad(xf, ((0, 0), (0, 0), (p0, p1), (p0, p1)))
    if c0 or c1:
        xf = xf[:, :, c0:xf.shape[2] - c1, c0:xf.shape[3] - c1]
    out = jax.lax.conv_general_dilated(
        xf, kf[None, None, :, :],
        window_strides=(1, 1), padding="VALID",
        dimension_numbers=("NCHW", "OIHW", "NCHW"),
        precision=jax.lax.Precision.HIGHEST)
    return out.reshape(N, C, out.shape[2], out.shape[3])


if __name__ == "__main__":
    key = jax.random.PRNGKey(0)
    x = jax.random.normal(key, (2, 4, 16, 16), dtype=jnp.float32)

    # 1) Typical StyleGAN2 usage: Blur([1,3,3,1], pad=(2,1)) -- separable, untiled path.
    blur = BlurPallas(kernel=[1, 3, 3, 1], pad=(2, 1), upsample_factor=1)
    y = jax.block_until_ready(blur(x))
    assert y.shape == (2, 4, 16, 16), y.shape
    ref = np.asarray(_reference_blur(x, [1, 3, 3, 1], (2, 1)))
    np.testing.assert_allclose(np.asarray(y), ref, atol=2e-5, rtol=2e-5)

    # 2) Same blur, forced H-tiled path (2 row tiles of 8 output rows, manual halo DMA).
    y_t = jax.block_until_ready(blur(x, h_tile=8))
    np.testing.assert_allclose(np.asarray(y_t), ref, atol=2e-5, rtol=2e-5)

    # 3) Asymmetric separable kernel + upsample_factor (checks flip direction & scaling).
    blur2 = BlurPallas(kernel=[1, 2, 4], pad=(1, 1), upsample_factor=2)
    y2 = jax.block_until_ready(blur2(x))
    np.testing.assert_allclose(
        np.asarray(y2),
        np.asarray(_reference_blur(x, [1, 2, 4], (1, 1), upsample_factor=2)),
        atol=2e-5, rtol=2e-5)

    # 4) Non-separable 2-D kernel (full tap-unroll path).
    k2d = np.array([[1.0, 2.0], [3.0, 4.0]], dtype=np.float32)
    blur3 = BlurPallas(kernel=k2d, pad=(1, 0), upsample_factor=1)
    y3 = jax.block_until_ready(blur3(x))
    np.testing.assert_allclose(
        np.asarray(y3), np.asarray(_reference_blur(x, k2d, (1, 0))),
        atol=2e-5, rtol=2e-5)

    # 5) Negative padding (crop) path.
    blur4 = BlurPallas(kernel=[1, 3, 3, 1], pad=(2, -1), upsample_factor=1)
    y4 = jax.block_until_ready(blur4(x))
    np.testing.assert_allclose(
        np.asarray(y4), np.asarray(_reference_blur(x, [1, 3, 3, 1], (2, -1))),
        atol=2e-5, rtol=2e-5)

    print("KERNEL_OK")
</pallas_src>

<mosaic_0001>
module attributes {stable_mosaic.version = 11 : i64} {
  func.func @kernel(%arg0: i32, %arg1: memref<8x16x16xf32, #tpu.memory_space<vmem>>, %arg2: memref<8x16x16xf32, #tpu.memory_space<vmem>>) attributes {dimension_semantics = [#tpu.dimension_semantics<parallel>], iteration_bounds = array<i64: 1>, scalar_prefetch = 0 : i64, scratch_operands = 0 : i64, tpu.core_type = #tpu.core_type<tc>, window_params = [{transform_indices = @transform_0, window_bounds = array<i64: 8, 16, 16>}, {transform_indices = @transform_1, window_bounds = array<i64: 8, 16, 16>}]} {
    %c0 = arith.constant 0 : index
    %c0_0 = arith.constant 0 : index
    %c0_1 = arith.constant 0 : index
    %0 = vector.load %arg1[%c0, %c0_0, %c0_1] : memref<8x16x16xf32, #tpu.memory_space<vmem>>, vector<8x16x16xf32>
    %cst = arith.constant 0.000000e+00 : f32
    %1 = vector.broadcast %cst : f32 to vector<8x2x16xf32>
    %cst_2 = arith.constant 0.000000e+00 : f32
    %2 = vector.broadcast %cst_2 : f32 to vector<8x1x16xf32>
    %3 = tpu.concatenate %1, %0, %2 in 1 : vector<8x2x16xf32>, vector<8x16x16xf32>, vector<8x1x16xf32> -> vector<8x19x16xf32>
    %cst_3 = arith.constant 0.000000e+00 : f32
    %4 = vector.broadcast %cst_3 : f32 to vector<8x19x2xf32>
    %cst_4 = arith.constant 0.000000e+00 : f32
    %5 = vector.broadcast %cst_4 : f32 to vector<8x19x1xf32>
    %6 = tpu.concatenate %4, %3, %5 in 2 : vector<8x19x2xf32>, vector<8x19x16xf32>, vector<8x19x1xf32> -> vector<8x19x19xf32>
    %7 = vector.extract_strided_slice %6 {offsets = [0, 0, 0], sizes = [8, 19, 16], strides = [1, 1, 1]} : vector<8x19x19xf32> to vector<8x19x16xf32>
    %8 = vector.extract_strided_slice %6 {offsets = [0, 0, 3], sizes = [8, 19, 16], strides = [1, 1, 1]} : vector<8x19x19xf32> to vector<8x19x16xf32>
    %9 = arith.addf %7, %8 : vector<8x19x16xf32>
    %cst_5 = arith.constant 1.250000e-01 : f32
    %10 = vector.broadcast %cst_5 : f32 to vector<8x19x16xf32>
    %11 = arith.mulf %10, %9 : vector<8x19x16xf32>
    %12 = vector.extract_strided_slice %6 {offsets = [0, 0, 1], sizes = [8, 19, 16], strides = [1, 1, 1]} : vector<8x19x19xf32> to vector<8x19x16xf32>
    %13 = vector.extract_strided_slice %6 {offsets = [0, 0, 2], sizes = [8, 19, 16], strides = [1, 1, 1]} : vector<8x19x19xf32> to vector<8x19x16xf32>
    %14 = arith.addf %12, %13 : vector<8x19x16xf32>
    %cst_6 = arith.constant 3.750000e-01 : f32
    %15 = vector.broadcast %cst_6 : f32 to vector<8x19x16xf32>
    %16 = arith.mulf %15, %14 : vector<8x19x16xf32>
    %17 = arith.addf %11, %16 : vector<8x19x16xf32>
    %18 = vector.extract_strided_slice %17 {offsets = [0, 0, 0], sizes = [8, 16, 16], strides = [1, 1, 1]} : vector<8x19x16xf32> to vector<8x16x16xf32>
    %19 = vector.extract_strided_slice %17 {offsets = [0, 3, 0], sizes = [8, 16, 16], strides = [1, 1, 1]} : vector<8x19x16xf32> to vector<8x16x16xf32>
    %20 = arith.addf %18, %19 : vector<8x16x16xf32>
    %cst_7 = arith.constant 1.250000e-01 : f32
    %21 = vector.broadcast %cst_7 : f32 to vector<8x16x16xf32>
    %22 = arith.mulf %21, %20 : vector<8x16x16xf32>
    %23 = vector.extract_strided_slice %17 {offsets = [0, 1, 0], sizes = [8, 16, 16], strides = [1, 1, 1]} : vector<8x19x16xf32> to vector<8x16x16xf32>
    %24 = vector.extract_strided_slice %17 {offsets = [0, 2, 0], sizes = [8, 16, 16], strides = [1, 1, 1]} : vector<8x19x16xf32> to vector<8x16x16xf32>
    %25 = arith.addf %23, %24 : vector<8x16x16xf32>
    %cst_8 = arith.constant 3.750000e-01 : f32
    %26 = vector.broadcast %cst_8 : f32 to vector<8x16x16xf32>
    %27 = arith.mulf %26, %25 : vector<8x16x16xf32>
    %28 = arith.addf %22, %27 : vector<8x16x16xf32>
    %c0_9 = arith.constant 0 : index
    %c0_10 = arith.constant 0 : index
    %c0_11 = arith.constant 0 : index
    %29 = vector.load %arg2[%c0_9, %c0_10, %c0_11] : memref<8x16x16xf32, #tpu.memory_space<vmem>>, vector<8x16x16xf32>
    tpu.vector_store %arg2[%c0_9, %c0_10, %c0_11], %28 {strides = array<i32>} : memref<8x16x16xf32, #tpu.memory_space<vmem>>, vector<8x16x16xf32>,
    return
  }
  func.func @transform_0(%arg0: i32) -> (i32, i32, i32) {
    %c0_i32 = arith.constant 0 : i32
    %c0_i32_0 = arith.constant 0 : i32
    %c0_i32_1 = arith.constant 0 : i32
    return %arg0, %c0_i32, %c0_i32_0 : i32, i32, i32
  }
  func.func @transform_1(%arg0: i32) -> (i32, i32, i32) {
    %c0_i32 = arith.constant 0 : i32
    %c0_i32_0 = arith.constant 0 : i32
    %c0_i32_1 = arith.constant 0 : i32
    return %arg0, %c0_i32, %c0_i32_0 : i32, i32, i32
  }
}

</mosaic_0001>

<bundles_post_ra>
// kernel: tpu_custom_call.1
= control target key start
LH: loop header
LB: loop body
LE: loop exit
PB: predicated region body
PF: predicated region fallthrough
CT: control target
= control target key end

     0   :  { %6 = vsyncpa [#allocation3], 0  ;;  %s1549_s0 = inlined_call_operand.hbm [shape: f32[8,16,16], index: 0, kind: input, shape index: {}]   ;;  %s1550_s1 = inlined_call_operand.hbm [shape: f32[8,16,16], index: 1, kind: output, shape index: {}]  }
   0x1   :  { %7 = vsyncpa [#allocation4], 0  ;;  %s1045_s6 = smov [#allocation2]   ;;  %s997_s10 = scalar_lea.hbm %s1549_s0, 2048 }
   0x2   :  { %s13_s7 = sshll.u32 %s1045_s6, 4  ;;  %p998_p0 = scmp.ne.s32.totalorder %s1549_s0, %s997_s10  ;;  %s14_s7 = int_to_ptr.vmem [resolvable:$true] %s13_s7 }
   0x3   :  { %p1001_p1 = scmp.lt.u32.totalorder %s997_s10, %s1549_s0 }
   0x5   :  { %p1003_p2 = pnand %p1001_p1, %p998_p0 }
   0x7   :  { %1006 = shalt.err (!%p1003_p2)
}
   0x8   :  { %s1007_s15 = scalar_lea.vmem %s14_s7, 2048  ;;  %p1012_p4 = scmp.lt.s32.totalorder %s14_s7, %s14_s7 }
   0x9   :  { %p1008_p3 = scmp.ne.s32.totalorder %s14_s7, %s1007_s15  ;;  %p1013_p5 = scmp.lt.s32.totalorder %s1007_s15, %s1007_s15 }
   0xb   :  { %p1014_p6 = por %p1013_p5, %p1012_p4 }
   0xd   :  { %p1015_p7 = pnand %p1014_p6, %p1008_p3 }
   0xf   :  { %1018 = shalt.err (!%p1015_p7)
}
  0x10   :  { %s1046_s16 = smov 128   ;;  %s1047_s17 = smov 8  }
  0x11   :  { %19 = dma.hbm_to_vmem [thread:$0]  %s1549_s0, 2048, %s14_s7, [#allocation3], %s1046_s16, %s1046_s16, %s1047_s17  }
  0x12   :  { %1041 = dma.done.wait [#allocation3], 2048  }
  0x13   :  { %1042 = vsyncadd [#allocation3], 4294965248  ;;  %v23_v0 = vld [vmem:[#allocation2] sm:$0xff]  ;;  %vm55_vm0 = vcmask 1041408   ;;  %v24_v1 = vld [vmem:[#allocation2 + $0x8] sm:$0xff]  ;;  %s1048_s20 = smov 2  }
  0x14   :  { %v25_v2 = vld [vmem:[#allocation2 + $0x10] sm:$0xff]  ;;  %v56_v3 = vrot.slane %v23_v0, 6  ;;  %v57_v4 = vrot.slane %v24_v1, 6  ;;  %v26_v6 = vld [vmem:[#allocation2 + $0x18] sm:$0xff]  ;;  %v27_v12 = vld [vmem:[#allocation2 + $0x20] sm:$0xff]  ;;  %vm200_vm1 = vcmask 15360  }
  0x15   :  { %v59_v5 = vrot.slane %v25_v2, 6  ;;  %v60_v11 = vrot.slane %v26_v6, 6  ;;  %v28_v13 = vld [vmem:[#allocation2 + $0x28] sm:$0xff]  ;;  %v62_v16 = vrot.slane %v27_v12, 6  ;;  %v29_v18 = vld [vmem:[#allocation2 + $0x30] sm:$0xff]  ;;  %v30_v22 = vld [vmem:[#allocation2 + $0x38] sm:$0xff] }
  0x16   :  { %v96_v7 = vsel %vm55_vm0, 0.0, %v56_v3  ;;  %v104_v8 = vsel %vm55_vm0, %v57_v4, 0.0  ;;  %v58_v9 = vsel %vm55_vm0, %v56_v3, %v57_v4  ;;  %v63_v17 = vrot.slane %v28_v13, 6  ;;  %v31_v26 = vld [vmem:[#allocation2 + $0x40] sm:$0xff]  ;;  %v32_v27 = vld [vmem:[#allocation2 + $0x48] sm:$0xff]  ;;  %v33_v32 = vld [vmem:[#allocation2 + $0x50] sm:$0xff] }
  0x17   :  { %128 = vrot.lane.b32.xlu0 %v96_v7, %s1048_s20  ;;  %132 = vrot.lane.b32.xlu1 %v104_v8, %s1048_s20  ;;  %v97_v10 = vsel %vm55_vm0, 0.0, %v59_v5  ;;  %v61_v14 = vsel %vm55_vm0, %v59_v5, %v60_v11  ;;  %v105_v15 = vsel %vm55_vm0, %v60_v11, 0.0  ;;  %v98_v20 = vsel %vm55_vm0, 0.0, %v62_v16  ;;  %v34_v36 = vld [vmem:[#allocation2 + $0x58] sm:$0xff]  ;;  %v35_v40 = vld [vmem:[#allocation2 + $0x60] sm:$0xff]  ;;  %v36_v41 = vld [vmem:[#allocation2 + $0x68] sm:$0xff] }
  0x18   :  { %v64_v19 = vsel %vm55_vm0, %v62_v16, %v63_v17  ;;  %v65_v21 = vrot.slane %v29_v18, 6  ;;  %v106_v24 = vsel %vm55_vm0, %v63_v17, 0.0  ;;  %v66_v25 = vrot.slane %v30_v22, 6  ;;  %v37_v46 = vld [vmem:[#allocation2 + $0x70] sm:$0xff]  ;;  %v38_v50 = vld [vmem:[#allocation2 + $0x78] sm:$0xff]  ;;  %s1049_s0 = smov 125  }
  0x19   :  { %v68_v30 = vrot.slane %v31_v26, 6  ;;  %v69_v31 = vrot.slane %v32_v27, 6  ;;  %v71_v35 = vrot.slane %v33_v32, 6  ;;  %v72_v39 = vrot.slane %v34_v36, 6  ;;  %s1050_s21 = smov 127   ;;  %s1051_s22 = smov [#allocation5]  }
  0x1a   :  { %v99_v23 = vsel %vm55_vm0, 0.0, %v65_v21  ;;  %v107_v28 = vsel %vm55_vm0, %v66_v25, 0.0  ;;  %v67_v29 = vsel %vm55_vm0, %v65_v21, %v66_v25  ;;  %v74_v44 = vrot.slane %v35_v40, 6  ;;  %s978_s23 = sshll.u32 %s1051_s22, 4  ;;  %s979_s23 = int_to_ptr.vmem [resolvable:$true] %s978_s23 }
  0x1b   :  { %130 = vrot.lane.b32.xlu0 %v58_v9, %s1048_s20  ;;  %134 = vrot.lane.b32.xlu1 %v97_v10, %s1048_s20  ;;  %v70_v33 = vsel %vm55_vm0, %v68_v30, %v69_v31  ;;  %v100_v34 = vsel %vm55_vm0, 0.0, %v68_v30  ;;  %v101_v37 = vsel %vm55_vm0, 0.0, %v71_v35  ;;  %v108_v38 = vsel %vm55_vm0, %v69_v31, 0.0  ;;  %s1019_s24 = scalar_lea.vmem %s979_s23, 2048  ;;  %p1024_p9 = scmp.lt.s32.totalorder %s979_s23, %s979_s23 }
  0x1c   :  { %v109_v42 = vsel %vm55_vm0, %v72_v39, 0.0  ;;  %v73_v43 = vsel %vm55_vm0, %v71_v35, %v72_v39  ;;  %v75_v45 = vrot.slane %v36_v41, 6  ;;  %v102_v48 = vsel %vm55_vm0, 0.0, %v74_v44  ;;  %p1020_p8 = scmp.ne.s32.totalorder %s979_s23, %s1019_s24  ;;  %p1025_p10 = scmp.lt.s32.totalorder %s1019_s24, %s1019_s24 }
  0x1d   :  { %v77_v49 = vrot.slane %v37_v46, 6  ;;  %v78_v53 = vrot.slane %v38_v50, 6  ;;  %vm225_vm2 = vcmask 146432   ;;  %vm658_vm3 = vcmask 1044480  }
  0x1e   :  { %v76_v47 = vsel %vm55_vm0, %v74_v44, %v75_v45  ;;  %v110_v52 = vsel %vm55_vm0, %v75_v45, 0.0  ;;  %vm747_vm4 = vcmask 1046528   ;;  %vm956_vm5 = vcmask 130048   ;;  %p1026_p11 = por %p1025_p10, %p1024_p9 }
  0x1f   :  { %136 = vrot.lane.b32.xlu0 %v61_v14, %s1048_s20  ;;  %138 = vrot.lane.b32.xlu1 %v105_v15, %s1048_s20  ;;  %v103_v51 = vsel %vm55_vm0, 0.0, %v77_v49  ;;  %v111_v54 = vsel %vm55_vm0, %v78_v53, 0.0  ;;  %v79_v55 = vsel %vm55_vm0, %v77_v49, %v78_v53 }
  0x20   :  { %p1027_p12 = pnand %p1026_p11, %p1020_p8 }
  0x23   :  { %142 = vrot.lane.b32.xlu1 %v64_v19, %s1048_s20  ;;  %140 = vrot.lane.b32.xlu0 %v98_v20, %s1048_s20 }
  0x27   :  { %146 = vrot.lane.b32.xlu1 %v99_v23, %s1048_s20  ;;  %144 = vrot.lane.b32.xlu0 %v106_v24, %s1048_s20 }
  0x2b   :  { %150 = vrot.lane.b32.xlu1 %v107_v28, %s1048_s20  ;;  %148 = vrot.lane.b32.xlu0 %v67_v29, %s1048_s20 }
  0x2f   :  { %154 = vrot.lane.b32.xlu1 %v70_v33, %s1048_s20  ;;  %152 = vrot.lane.b32.xlu0 %v100_v34, %s1048_s20 }
  0x33   :  { %158 = vrot.lane.b32.xlu1 %v101_v37, %s1048_s20  ;;  %156 = vrot.lane.b32.xlu0 %v108_v38, %s1048_s20 }
  0x37   :  { %162 = vrot.lane.b32.xlu1 %v109_v42, %s1048_s20  ;;  %160 = vrot.lane.b32.xlu0 %v73_v43, %s1048_s20 }
  0x3b   :  { %166 = vrot.lane.b32.xlu1 %v76_v47, %s1048_s20  ;;  %164 = vrot.lane.b32.xlu0 %v102_v48, %s1048_s20 }
  0x3f   :  { %170 = vrot.lane.b32.xlu1 %v103_v51, %s1048_s20  ;;  %168 = vrot.lane.b32.xlu0 %v110_v52, %s1048_s20 }
  0x43   :  { %174 = vrot.lane.b32.xlu1 %v111_v54, %s1048_s20  ;;  %172 = vrot.lane.b32.xlu0 %v79_v55, %s1048_s20 }
  0x89   :  { %v129_v56 = vpop.permute.xlu0 %128  ;;  %v133_v57 = vpop.permute.xlu1 %132 }
  0x8a   :  { %v201_v58 = vsel %vm200_vm1, 0.0, %v129_v56  ;;  %v203_v59 = vsel %vm200_vm1, 0.0, %v133_v57 }
  0x8b   :  { %v1128_v60 = vsel %vm225_vm2, %v201_v58, 0.0  ;;  %v1133_v61 = vsel %vm225_vm2, %v203_v59, 0.0 }
  0x8c   :  { %274 = vrot.lane.b32.xlu0 %v1128_v60, %s1049_s0 }
  0x8d   :  { %v131_v62 = vpop.permute.xlu0 %130  ;;  %v135_v63 = vpop.permute.xlu1 %134 }
  0x8e   :  { %v202_v0 = vsel %vm200_vm1, 0.0, %v131_v62  ;;  %v204_v1 = vsel %vm200_vm1, 0.0, %v135_v63 }
  0x8f   :  { %v1138_v2 = vsel %vm225_vm2, %v202_v0, 0.0  ;;  %v1145_v3 = vsel %vm225_vm2, %v204_v1, 0.0 }
  0x90   :  { %278 = vrot.lane.b32.xlu0 %v1133_v61, %s1049_s0  ;;  %276 = vrot.lane.b32.xlu1 %v1138_v2, %s1049_s0 }
  0x91   :  { %v137_v4 = vpop.permute.xlu0 %136  ;;  %v139_v5 = vpop.permute.xlu1 %138 }
  0x92   :  { %v205_v6 = vsel %vm200_vm1, 0.0, %v137_v4  ;;  %v206_v12 = vsel %vm200_vm1, 0.0, %v139_v5 }
  0x93   :  { %v1149_v7 = vsel %vm225_vm2, %v205_v6, 0.0  ;;  %v1165_v13 = vsel %vm225_vm2, %v206_v12, 0.0 }
  0x94   :  { %280 = vrot.lane.b32.xlu1 %v1145_v3, %s1049_s0  ;;  %282 = vrot.lane.b32.xlu0 %v1149_v7, %s1049_s0 }
  0x95   :  { %v143_v8 = vpop.permute.xlu1 %142  ;;  %v141_v9 = vpop.permute.xlu0 %140 }
  0x96   :  { %v208_v16 = vsel %vm200_vm1, 0.0, %v143_v8  ;;  %v207_v17 = vsel %vm200_vm1, 0.0, %v141_v9 }
  0x97   :  { %v1174_v18 = vsel %vm225_vm2, %v208_v16, 0.0  ;;  %v1177_v19 = vsel %vm225_vm2, %v207_v17, 0.0 }
  0x98   :  { %394 = vrot.lane.b32.xlu1 %v1128_v60, %s1050_s21  ;;  %396 = vrot.lane.b32.xlu0 %v1138_v2, %s1050_s21 }
  0x99   :  { %v147_v10 = vpop.permute.xlu1 %146  ;;  %v145_v11 = vpop.permute.xlu0 %144 }
  0x9a   :  { %v210_v22 = vsel %vm200_vm1, 0.0, %v147_v10  ;;  %v209_v23 = vsel %vm200_vm1, 0.0, %v145_v11 }
  0x9b   :  { %v1186_v24 = vsel %vm225_vm2, %v210_v22, 0.0  ;;  %v1189_v25 = vsel %vm225_vm2, %v209_v23, 0.0 }
  0x9c   :  { %398 = vrot.lane.b32.xlu1 %v1133_v61, %s1050_s21  ;;  %400 = vrot.lane.b32.xlu0 %v1145_v3, %s1050_s21 }
  0x9d   :  { %v151_v14 = vpop.permute.xlu1 %150  ;;  %v149_v15 = vpop.permute.xlu0 %148 }
  0x9e   :  { %v212_v28 = vsel %vm200_vm1, 0.0, %v151_v14  ;;  %v211_v29 = vsel %vm200_vm1, 0.0, %v149_v15 }
  0x9f   :  { %v1198_v30 = vsel %vm225_vm2, %v212_v28, 0.0  ;;  %v1201_v31 = vsel %vm225_vm2, %v211_v29, 0.0 }
  0xa0   :  { %402 = vrot.lane.b32.xlu1 %v1149_v7, %s1050_s21  ;;  %404 = vrot.lane.b32.xlu0 %v1165_v13, %s1050_s21 }
  0xa1   :  { %v155_v20 = vpop.permute.xlu1 %154  ;;  %v153_v21 = vpop.permute.xlu0 %152 }
  0xa2   :  { %v214_v34 = vsel %vm200_vm1, 0.0, %v155_v20  ;;  %v213_v35 = vsel %vm200_vm1, 0.0, %v153_v21 }
  0xa3   :  { %v1210_v36 = vsel %vm225_vm2, %v214_v34, 0.0  ;;  %v1213_v37 = vsel %vm225_vm2, %v213_v35, 0.0 }
  0xa4   :  { %408 = vrot.lane.b32.xlu0 %v1174_v18, %s1050_s21  ;;  %406 = vrot.lane.b32.xlu1 %v1177_v19, %s1050_s21 }
  0xa5   :  { %v159_v26 = vpop.permute.xlu1 %158  ;;  %v157_v27 = vpop.permute.xlu0 %156 }
  0xa6   :  { %v216_v38 = vsel %vm200_vm1, 0.0, %v159_v26  ;;  %v215_v39 = vsel %vm200_vm1, 0.0, %v157_v27 }
  0xa7   :  { %v1222_v42 = vsel %vm225_vm2, %v216_v38, 0.0  ;;  %v1225_v43 = vsel %vm225_vm2, %v215_v39, 0.0 }
  0xa8   :  { %412 = vrot.lane.b32.xlu0 %v1186_v24, %s1050_s21  ;;  %410 = vrot.lane.b32.xlu1 %v1189_v25, %s1050_s21 }
  0xa9   :  { %v163_v32 = vpop.permute.xlu1 %162  ;;  %v161_v33 = vpop.permute.xlu0 %160 }
  0xaa   :  { %v218_v44 = vsel %vm200_vm1, 0.0, %v163_v32  ;;  %v217_v45 = vsel %vm200_vm1, 0.0, %v161_v33 }
  0xab   :  { %v1234_v46 = vsel %vm225_vm2, %v218_v44, 0.0  ;;  %v1237_v47 = vsel %vm225_vm2, %v217_v45, 0.0 }
  0xac   :  { %416 = vrot.lane.b32.xlu0 %v1198_v30, %s1050_s21  ;;  %414 = vrot.lane.b32.xlu1 %v1201_v31, %s1050_s21 }
  0xad   :  { %v167_v40 = vpop.permute.xlu1 %166  ;;  %v165_v41 = vpop.permute.xlu0 %164 }
  0xae   :  { %v220_v50 = vsel %vm200_vm1, 0.0, %v167_v40  ;;  %v219_v51 = vsel %vm200_vm1, 0.0, %v165_v41 }
  0xaf   :  { %v1246_v52 = vsel %vm225_vm2, %v220_v50, 0.0  ;;  %v1249_v53 = vsel %vm225_vm2, %v219_v51, 0.0 }
  0xb0   :  { %420 = vrot.lane.b32.xlu0 %v1210_v36, %s1050_s21  ;;  %418 = vrot.lane.b32.xlu1 %v1213_v37, %s1050_s21 }
  0xb1   :  { %v171_v48 = vpop.permute.xlu1 %170  ;;  %v169_v49 = vpop.permute.xlu0 %168 }
  0xb2   :  { %v222_v54 = vsel %vm200_vm1, 0.0, %v171_v48  ;;  %v221_v55 = vsel %vm200_vm1, 0.0, %v169_v49 }
  0xb3   :  { %v1258_v58 = vsel %vm225_vm2, %v222_v54, 0.0  ;;  %v1261_v59 = vsel %vm225_vm2, %v221_v55, 0.0 }
  0xb4   :  { %424 = vrot.lane.b32.xlu0 %v1222_v42, %s1050_s21  ;;  %422 = vrot.lane.b32.xlu1 %v1225_v43, %s1050_s21 }
  0xb5   :  { %v175_v56 = vpop.permute.xlu1 %174  ;;  %v173_v57 = vpop.permute.xlu0 %172 }
  0xb6   :  { %v224_v62 = vsel %vm200_vm1, 0.0, %v175_v56  ;;  %v223_v63 = vsel %vm200_vm1, 0.0, %v173_v57 }
  0xb7   :  { %v1270_v0 = vsel %vm225_vm2, %v224_v62, 0.0  ;;  %v1273_v1 = vsel %vm225_vm2, %v223_v63, 0.0 }
  0xb8   :  { %428 = vrot.lane.b32.xlu0 %v1234_v46, %s1050_s21  ;;  %426 = vrot.lane.b32.xlu1 %v1237_v47, %s1050_s21 }
  0xbc   :  { %432 = vrot.lane.b32.xlu0 %v1246_v52, %s1050_s21  ;;  %430 = vrot.lane.b32.xlu1 %v1249_v53, %s1050_s21 }
  0xc0   :  { %436 = vrot.lane.b32.xlu0 %v1258_v58, %s1050_s21  ;;  %434 = vrot.lane.b32.xlu1 %v1261_v59, %s1050_s21 }
  0xc4   :  { %440 = vrot.lane.b32.xlu0 %v1270_v0, %s1050_s21  ;;  %438 = vrot.lane.b32.xlu1 %v1273_v1, %s1050_s21 }
  0xc8   :  { %286 = vrot.lane.b32.xlu0 %v1177_v19, %s1049_s0  ;;  %284 = vrot.lane.b32.xlu1 %v1165_v13, %s1049_s0 }
  0xcc   :  { %290 = vrot.lane.b32.xlu0 %v1189_v25, %s1049_s0  ;;  %288 = vrot.lane.b32.xlu1 %v1174_v18, %s1049_s0 }
  0xd0   :  { %294 = vrot.lane.b32.xlu0 %v1201_v31, %s1049_s0  ;;  %292 = vrot.lane.b32.xlu1 %v1186_v24, %s1049_s0 }
  0xd4   :  { %298 = vrot.lane.b32.xlu0 %v1213_v37, %s1049_s0  ;;  %296 = vrot.lane.b32.xlu1 %v1198_v30, %s1049_s0 }
  0xd8   :  { %302 = vrot.lane.b32.xlu0 %v1225_v43, %s1049_s0  ;;  %300 = vrot.lane.b32.xlu1 %v1210_v36, %s1049_s0 }
  0xdc   :  { %306 = vrot.lane.b32.xlu0 %v1237_v47, %s1049_s0  ;;  %304 = vrot.lane.b32.xlu1 %v1222_v42, %s1049_s0 }
  0xe0   :  { %310 = vrot.lane.b32.xlu0 %v1249_v53, %s1049_s0  ;;  %308 = vrot.lane.b32.xlu1 %v1234_v46, %s1049_s0 }
  0xe4   :  { %314 = vrot.lane.b32.xlu0 %v1261_v59, %s1049_s0  ;;  %312 = vrot.lane.b32.xlu1 %v1246_v52, %s1049_s0 }
  0xe8   :  { %318 = vrot.lane.b32.xlu0 %v1273_v1, %s1049_s0  ;;  %316 = vrot.lane.b32.xlu1 %v1258_v58, %s1049_s0 }
  0xec   :  { %320 = vrot.lane.b32.xlu1 %v1270_v0, %s1049_s0 }
  0xfe   :  { %v1317_v4 = vpop.permute.xlu0 %274 }
 0x102   :  { %v1319_v5 = vpop.permute.xlu1 %276  ;;  %v1321_v6 = vpop.permute.xlu0 %278 }
 0x106   :  { %v1323_v8 = vpop.permute.xlu1 %280  ;;  %v1325_v9 = vpop.permute.xlu0 %282 }
 0x10a   :  { %v395_v10 = vpop.permute.xlu1 %394  ;;  %v397_v11 = vpop.permute.xlu0 %396 }
 0x10b   :  { %v466_v12 = vadd.f32 %v395_v10, %v1128_v60  ;;  %v467_v14 = vadd.f32 %v397_v11, %v1138_v2 }
 0x10d   :  { %v490_v15 = vmul.f32 0.375, %v466_v12  ;;  %v491_v16 = vmul.f32 0.375, %v467_v14 }
 0x10e   :  { %v399_v17 = vpop.permute.xlu1 %398  ;;  %v401_v20 = vpop.permute.xlu0 %400 }
 0x10f   :  { %v468_v21 = vadd.f32 %v399_v17, %v1133_v61  ;;  %v469_v22 = vadd.f32 %v401_v20, %v1145_v3  ;;  %538 = vrot.lane.b32.xlu0 %v490_v15, %s1050_s21  ;;  %540 = vrot.lane.b32.xlu1 %v491_v16, %s1050_s21 }
 0x111   :  { %v492_v23 = vmul.f32 0.375, %v468_v21  ;;  %v493_v26 = vmul.f32 0.375, %v469_v22 }
 0x112   :  { %v403_v27 = vpop.permute.xlu1 %402  ;;  %v405_v28 = vpop.permute.xlu0 %404 }
 0x113   :  { %v470_v29 = vadd.f32 %v403_v27, %v1149_v7  ;;  %v471_v32 = vadd.f32 %v405_v28, %v1165_v13  ;;  %542 = vrot.lane.b32.xlu0 %v492_v23, %s1050_s21  ;;  %544 = vrot.lane.b32.xlu1 %v493_v26, %s1050_s21 }
 0x115   :  { %v494_v33 = vmul.f32 0.375, %v470_v29  ;;  %v495_v34 = vmul.f32 0.375, %v471_v32 }
 0x116   :  { %v407_v35 = vpop.permute.xlu1 %406  ;;  %v409_v38 = vpop.permute.xlu0 %408 }
 0x117   :  { %v472_v39 = vadd.f32 %v407_v35, %v1177_v19  ;;  %v473_v40 = vadd.f32 %v409_v38, %v1174_v18  ;;  %546 = vrot.lane.b32.xlu0 %v494_v33, %s1050_s21  ;;  %548 = vrot.lane.b32.xlu1 %v495_v34, %s1050_s21 }
 0x119   :  { %v496_v41 = vmul.f32 0.375, %v472_v39  ;;  %v497_v44 = vmul.f32 0.375, %v473_v40 }
 0x11a   :  { %v411_v45 = vpop.permute.xlu1 %410  ;;  %v413_v48 = vpop.permute.xlu0 %412 }
 0x11b   :  { %v474_v49 = vadd.f32 %v411_v45, %v1189_v25  ;;  %v475_v50 = vadd.f32 %v413_v48, %v1186_v24  ;;  %550 = vrot.lane.b32.xlu0 %v496_v41, %s1050_s21  ;;  %552 = vrot.lane.b32.xlu1 %v497_v44, %s1050_s21 }
 0x11d   :  { %v498_v51 = vmul.f32 0.375, %v474_v49  ;;  %v499_v54 = vmul.f32 0.375, %v475_v50 }
 0x11e   :  { %v415_v55 = vpop.permute.xlu1 %414  ;;  %v417_v56 = vpop.permute.xlu0 %416 }
 0x11f   :  { %v476_v57 = vadd.f32 %v415_v55, %v1201_v31  ;;  %v477_v62 = vadd.f32 %v417_v56, %v1198_v30  ;;  %554 = vrot.lane.b32.xlu0 %v498_v51, %s1050_s21  ;;  %556 = vrot.lane.b32.xlu1 %v499_v54, %s1050_s21 }
 0x121   :  { %v500_v63 = vmul.f32 0.375, %v476_v57  ;;  %v501_v10 = vmul.f32 0.375, %v477_v62 }
 0x122   :  { %v419_v11 = vpop.permute.xlu1 %418  ;;  %v421_v12 = vpop.permute.xlu0 %420 }
 0x123   :  { %v478_v14 = vadd.f32 %v419_v11, %v1213_v37  ;;  %v479_v15 = vadd.f32 %v421_v12, %v1210_v36  ;;  %558 = vrot.lane.b32.xlu0 %v500_v63, %s1050_s21  ;;  %560 = vrot.lane.b32.xlu1 %v501_v10, %s1050_s21 }
 0x125   :  { %v502_v16 = vmul.f32 0.375, %v478_v14  ;;  %v503_v17 = vmul.f32 0.375, %v479_v15 }
 0x126   :  { %v423_v20 = vpop.permute.xlu1 %422  ;;  %v425_v21 = vpop.permute.xlu0 %424 }
 0x127   :  { %v480_v22 = vadd.f32 %v423_v20, %v1225_v43  ;;  %v481_v23 = vadd.f32 %v425_v21, %v1222_v42  ;;  %562 = vrot.lane.b32.xlu0 %v502_v16, %s1050_s21  ;;  %564 = vrot.lane.b32.xlu1 %v503_v17, %s1050_s21 }
 0x129   :  { %v504_v26 = vmul.f32 0.375, %v480_v22  ;;  %v505_v27 = vmul.f32 0.375, %v481_v23 }
 0x12a   :  { %v427_v28 = vpop.permute.xlu1 %426  ;;  %v429_v29 = vpop.permute.xlu0 %428 }
 0x12b   :  { %v482_v32 = vadd.f32 %v427_v28, %v1237_v47  ;;  %v483_v33 = vadd.f32 %v429_v29, %v1234_v46  ;;  %566 = vrot.lane.b32.xlu0 %v504_v26, %s1050_s21  ;;  %568 = vrot.lane.b32.xlu1 %v505_v27, %s1050_s21 }
 0x12d   :  { %v506_v34 = vmul.f32 0.375, %v482_v32  ;;  %v507_v35 = vmul.f32 0.375, %v483_v33 }
 0x12e   :  { %v431_v38 = vpop.permute.xlu1 %430  ;;  %v433_v39 = vpop.permute.xlu0 %432 }
 0x12f   :  { %v484_v40 = vadd.f32 %v431_v38, %v1249_v53  ;;  %v485_v41 = vadd.f32 %v433_v39, %v1246_v52  ;;  %570 = vrot.lane.b32.xlu0 %v506_v34, %s1050_s21  ;;  %572 = vrot.lane.b32.xlu1 %v507_v35, %s1050_s21  ;;  %v346_v38 = vadd.f32 %v1317_v4, %v1128_v60 }
 0x130   :  { %v347_v39 = vadd.f32 %v1319_v5, %v1138_v2 }
 0x131   :  { %v508_v44 = vmul.f32 0.375, %v484_v40  ;;  %v509_v45 = vmul.f32 0.375, %v485_v41  ;;  %v348_v40 = vadd.f32 %v1321_v6, %v1133_v61  ;;  %v349_v41 = vadd.f32 %v1323_v8, %v1145_v3 }
 0x132   :  { %v435_v48 = vpop.permute.xlu1 %434  ;;  %v437_v49 = vpop.permute.xlu0 %436  ;;  %v370_v5 = vmul.f32 0.125, %v346_v38  ;;  %v371_v3 = vmul.f32 0.125, %v347_v39 }
 0x133   :  { %v486_v50 = vadd.f32 %v435_v48, %v1261_v59  ;;  %v487_v51 = vadd.f32 %v437_v49, %v1258_v58  ;;  %574 = vrot.lane.b32.xlu0 %v508_v44, %s1050_s21  ;;  %576 = vrot.lane.b32.xlu1 %v509_v45, %s1050_s21  ;;  %v350_v44 = vadd.f32 %v1325_v9, %v1149_v7  ;;  %v372_v7 = vmul.f32 0.125, %v348_v40 }
 0x134   :  { %v373_v8 = vmul.f32 0.125, %v349_v41 }
 0x135   :  { %v510_v54 = vmul.f32 0.375, %v486_v50  ;;  %v511_v55 = vmul.f32 0.375, %v487_v51 }
 0x136   :  { %v439_v56 = vpop.permute.xlu1 %438  ;;  %v441_v57 = vpop.permute.xlu0 %440 }
 0x137   :  { %v488_v62 = vadd.f32 %v439_v56, %v1273_v1  ;;  %v489_v63 = vadd.f32 %v441_v57, %v1270_v0  ;;  %578 = vrot.lane.b32.xlu0 %v510_v54, %s1050_s21  ;;  %580 = vrot.lane.b32.xlu1 %v511_v55, %s1050_s21 }
 0x139   :  { %v512_v10 = vmul.f32 0.375, %v488_v62  ;;  %v513_v11 = vmul.f32 0.375, %v489_v63 }
 0x13a   :  { %v285_v12 = vpop.permute.xlu1 %284  ;;  %v287_v14 = vpop.permute.xlu0 %286 }
 0x13b   :  { %582 = vrot.lane.b32.xlu0 %v512_v10, %s1050_s21  ;;  %584 = vrot.lane.b32.xlu1 %v513_v11, %s1050_s21  ;;  %v351_v45 = vadd.f32 %v285_v12, %v1165_v13  ;;  %v352_v48 = vadd.f32 %v287_v14, %v1177_v19 }
 0x13d   :  { %v375_v9 = vmul.f32 0.125, %v351_v45 }
 0x13e   :  { %v289_v15 = vpop.permute.xlu1 %288  ;;  %v291_v16 = vpop.permute.xlu0 %290 }
 0x13f   :  { %v353_v49 = vadd.f32 %v289_v15, %v1174_v18  ;;  %v354_v60 = vadd.f32 %v291_v16, %v1189_v25  ;;  %v374_v18 = vmul.f32 0.125, %v350_v44  ;;  %v1397_v25 = vmul.f32 0.125, %v352_v48 }
 0x142   :  { %v293_v17 = vpop.permute.xlu1 %292  ;;  %v295_v20 = vpop.permute.xlu0 %294 }
 0x143   :  { %v355_v4 = vadd.f32 %v293_v17, %v1186_v24  ;;  %v356_v2 = vadd.f32 %v295_v20, %v1201_v31  ;;  %v1399_v24 = vmul.f32 0.125, %v353_v49  ;;  %v1401_v31 = vmul.f32 0.125, %v354_v60 }
 0x145   :  { %v1403_v50 = vmul.f32 0.125, %v355_v4  ;;  %v1405_v51 = vmul.f32 0.125, %v356_v2 }
 0x146   :  { %v297_v21 = vpop.permute.xlu1 %296  ;;  %v299_v22 = vpop.permute.xlu0 %298 }
 0x147   :  { %v357_v13 = vadd.f32 %v297_v21, %v1198_v30  ;;  %v358_v19 = vadd.f32 %v299_v22, %v1213_v37 }
 0x149   :  { %v1411_v62 = vmul.f32 0.125, %v357_v13  ;;  %v1413_v63 = vmul.f32 0.125, %v358_v19 }
 0x14a   :  { %v301_v23 = vpop.permute.xlu1 %300  ;;  %v303_v26 = vpop.permute.xlu0 %302 }
 0x14b   :  { %v359_v54 = vadd.f32 %v301_v23, %v1210_v36  ;;  %v360_v55 = vadd.f32 %v303_v26, %v1225_v43 }
 0x14d   :  { %v1419_v17 = vmul.f32 0.125, %v359_v54  ;;  %v1421_v20 = vmul.f32 0.125, %v360_v55 }
 0x14e   :  { %v305_v27 = vpop.permute.xlu1 %304  ;;  %v307_v28 = vpop.permute.xlu0 %306 }
 0x14f   :  { %v361_v30 = vadd.f32 %v305_v27, %v1222_v42  ;;  %v362_v37 = vadd.f32 %v307_v28, %v1237_v47 }
 0x151   :  { %v1423_v21 = vmul.f32 0.125, %v361_v30  ;;  %v1425_v22 = vmul.f32 0.125, %v362_v37 }
 0x152   :  { %v309_v29 = vpop.permute.xlu1 %308  ;;  %v311_v32 = vpop.permute.xlu0 %310 }
 0x153   :  { %v363_v12 = vadd.f32 %v309_v29, %v1234_v46  ;;  %v364_v14 = vadd.f32 %v311_v32, %v1249_v53 }
 0x155   :  { %v1429_v27 = vmul.f32 0.125, %v363_v12  ;;  %v1431_v28 = vmul.f32 0.125, %v364_v14 }
 0x156   :  { %v313_v33 = vpop.permute.xlu1 %312  ;;  %v315_v34 = vpop.permute.xlu0 %314 }
 0x157   :  { %v365_v36 = vadd.f32 %v313_v33, %v1246_v52  ;;  %v366_v43 = vadd.f32 %v315_v34, %v1261_v59 }
 0x159   :  { %v1433_v33 = vmul.f32 0.125, %v365_v36  ;;  %v1435_v34 = vmul.f32 0.125, %v366_v43 }
 0x15a   :  { %v1375_v35 = vpop.permute.xlu1 %316  ;;  %v319_v61 = vpop.permute.xlu0 %318 }
 0x15b   :  { %v367_v40 = vadd.f32 %v1375_v35, %v1258_v58  ;;  %v1440_v41 = vadd.f32 %v319_v61, %v1273_v1 }
 0x15e   :  { %v1393_v6 = vpop.permute.xlu1 %320 }
 0x181   :  { %v541_v56 = vpop.permute.xlu1 %540  ;;  %v539_v57 = vpop.permute.xlu0 %538 }
 0x182   :  { %v611_v10 = vadd.f32 %v541_v56, %v371_v3  ;;  %v610_v11 = vadd.f32 %v539_v57, %v370_v5 }
 0x184   :  { %v660_v15 = vrot.slane %v611_v10, 3  ;;  %v749_v42 = vrot.slane %v611_v10, 1  ;;  %v659_v16 = vrot.slane %v610_v11, 3  ;;  %v748_v47 = vrot.slane %v610_v11, 1 }
 0x185   :  { %v545_v23 = vpop.permute.xlu1 %544  ;;  %v543_v46 = vpop.permute.xlu0 %542 }
 0x186   :  { %v661_v53 = vsel %vm658_vm3, %v659_v16, %v660_v15  ;;  %v750_v52 = vsel %vm747_vm4, %v748_v47, %v749_v42  ;;  %v613_v26 = vadd.f32 %v545_v23, %v373_v8  ;;  %v612_v59 = vadd.f32 %v543_v46, %v372_v7 }
 0x187   :  { %v715_v29 = vadd.f32 %v661_v53, %v610_v11  ;;  %v812_v32 = vadd.f32 %v750_v52, %v610_v11 }
 0x188   :  { %v662_v38 = vrot.slane %v612_v59, 3  ;;  %v751_v39 = vrot.slane %v612_v59, 1  ;;  %v664_v45 = vrot.slane %v613_v26, 3  ;;  %v753_v3 = vrot.slane %v613_v26, 1 }
 0x189   :  { %v836_v44 = vmul.f32 0.375, %v812_v32  ;;  %v549_v48 = vpop.permute.xlu1 %548  ;;  %v547_v49 = vpop.permute.xlu0 %546  ;;  %v731_v8 = vmul.f32 0.125, %v715_v29 }
 0x18a   :  { %v663_v60 = vsel %vm658_vm3, %v660_v15, %v662_v38  ;;  %v752_v4 = vsel %vm747_vm4, %v749_v42, %v751_v39  ;;  %v814_v2 = vadd.f32 %v751_v39, %v612_v59  ;;  %v615_v5 = vadd.f32 %v549_v48, %v375_v9 }
 0x18b   :  { %v716_v7 = vadd.f32 %v663_v60, %v611_v10  ;;  %v813_v13 = vadd.f32 %v752_v4, %v611_v10  ;;  %v614_v19 = vadd.f32 %v547_v49, %v374_v18  ;;  %v884_v61 = vrot.slane %v836_v44, 1 }
 0x18c   :  { %v838_v58 = vmul.f32 0.375, %v814_v2  ;;  %v667_v35 = vrot.slane %v615_v5, 3  ;;  %v756_v1 = vrot.slane %v615_v5, 1  ;;  %v1452_v59 = vmul.f32 0.125, %v367_v40 }
 0x18d   :  { %v837_v54 = vmul.f32 0.375, %v813_v13  ;;  %v665_v55 = vrot.slane %v614_v19, 3  ;;  %v754_v30 = vrot.slane %v614_v19, 1  ;;  %v553_v37 = vpop.permute.xlu1 %552  ;;  %v551_v56 = vpop.permute.xlu0 %550  ;;  %v732_v57 = vmul.f32 0.125, %v716_v7 }
 0x18e   :  { %v887_v11 = vrot.slane %v838_v58, 1  ;;  %v817_v12 = vadd.f32 %v756_v1, %v615_v5  ;;  %v617_v14 = vadd.f32 %v553_v37, %v1399_v24  ;;  %v616_v16 = vadd.f32 %v551_v56, %v1397_v25 }
 0x18f   :  { %v885_v9 = vrot.slane %v837_v54, 1  ;;  %v666_v36 = vsel %vm658_vm3, %v664_v45, %v665_v55  ;;  %v668_v18 = vsel %vm658_vm3, %v665_v55, %v667_v35  ;;  %v755_v10 = vsel %vm747_vm4, %v753_v3, %v754_v30 }
 0x190   :  { %v841_v43 = vmul.f32 0.375, %v817_v12  ;;  %v717_v15 = vadd.f32 %v666_v36, %v613_v26  ;;  %v757_v42 = vsel %vm747_vm4, %v754_v30, %v756_v1  ;;  %v815_v46 = vadd.f32 %v755_v10, %v613_v26 }
 0x191   :  { %v886_v47 = vsel %vm747_vm4, %v884_v61, %v885_v9  ;;  %v888_v23 = vsel %vm747_vm4, %v885_v9, %v887_v11  ;;  %v816_v53 = vadd.f32 %v757_v42, %v614_v19  ;;  %v557_v24 = vpop.permute.xlu1 %556  ;;  %v555_v52 = vpop.permute.xlu0 %554  ;;  %v718_v38 = vadd.f32 %v668_v18, %v614_v19 }
 0x192   :  { %v940_v29 = vadd.f32 %v886_v47, %v731_v8  ;;  %v941_v32 = vadd.f32 %v888_v23, %v732_v57  ;;  %v892_v39 = vrot.slane %v841_v43, 1  ;;  %v839_v44 = vmul.f32 0.375, %v815_v46 }
 0x193   :  { %v840_v45 = vmul.f32 0.375, %v816_v53  ;;  %v670_v48 = vrot.slane %v617_v14, 3  ;;  %v759_v25 = vrot.slane %v617_v14, 1  ;;  %v669_v49 = vrot.slane %v616_v16, 3 }
 0x194   :  { %957 = vst.msk [vmem:[#allocation5] sm:$0xff] %vm956_vm5, %v940_v29  ;;  %958 = vst.msk [vmem:[#allocation5 + $0x8] sm:$0xff] %vm956_vm5, %v941_v32  ;;  %v758_v60 = vrot.slane %v616_v16, 1  ;;  %v619_v26 = vadd.f32 %v557_v24, %v1403_v50  ;;  %v369_v40 = vadd.f32 %v1393_v6, %v1270_v0  ;;  %v889_v4 = vrot.slane %v839_v44, 1 }
 0x195   :  { %v890_v2 = vrot.slane %v840_v45, 1  ;;  %v618_v5 = vadd.f32 %v555_v52, %v1401_v31  ;;  %v561_v3 = vpop.permute.xlu1 %560  ;;  %v559_v7 = vpop.permute.xlu0 %558  ;;  %v733_v13 = vmul.f32 0.125, %v717_v15  ;;  %v734_v19 = vmul.f32 0.125, %v718_v38 }
 0x196   :  { %v671_v8 = vsel %vm658_vm3, %v669_v49, %v670_v48  ;;  %v760_v58 = vsel %vm747_vm4, %v758_v60, %v759_v25  ;;  %v674_v61 = vrot.slane %v619_v26, 3  ;;  %v621_v37 = vadd.f32 %v561_v3, %v1411_v62 }
 0x197   :  { %v891_v35 = vsel %vm747_vm4, %v889_v4, %v890_v2  ;;  %v893_v1 = vsel %vm747_vm4, %v890_v2, %v892_v39  ;;  %v818_v50 = vadd.f32 %v760_v58, %v616_v16  ;;  %v672_v6 = vrot.slane %v618_v5, 3 }
 0x198   :  { %v942_v54 = vadd.f32 %v891_v35, %v733_v13  ;;  %v943_v0 = vadd.f32 %v893_v1, %v734_v19  ;;  %v761_v55 = vrot.slane %v618_v5, 1  ;;  %v719_v30 = vadd.f32 %v671_v8, %v616_v16 }
 0x199   :  { %v842_v31 = vmul.f32 0.375, %v818_v50  ;;  %v620_v56 = vadd.f32 %v559_v7, %v1405_v51  ;;  %v565_v57 = vpop.permute.xlu1 %564  ;;  %v563_v11 = vpop.permute.xlu0 %562  ;;  %v763_v12 = vrot.slane %v619_v26, 1  ;;  %v673_v9 = vsel %vm658_vm3, %v670_v48, %v672_v6 }
 0x19a   :  { %959 = vst.msk [vmem:[#allocation5 + $0x10] sm:$0xff] %vm956_vm5, %v942_v54  ;;  %960 = vst.msk [vmem:[#allocation5 + $0x18] sm:$0xff] %vm956_vm5, %v943_v0  ;;  %v762_v36 = vsel %vm747_vm4, %v759_v25, %v761_v55  ;;  %v820_v18 = vadd.f32 %v761_v55, %v618_v5  ;;  %v720_v10 = vadd.f32 %v673_v9, %v617_v14  ;;  %v677_v15 = vrot.slane %v621_v37, 3 }
 0x19b   :  { %v819_v43 = vadd.f32 %v762_v36, %v617_v14  ;;  %v1471_v42 = vadd.f32 %v565_v57, %v1419_v17  ;;  %v766_v51 = vrot.slane %v621_v37, 1  ;;  %v675_v16 = vrot.slane %v620_v56, 3 }
 0x19c   :  { %v844_v62 = vmul.f32 0.375, %v820_v18  ;;  %v764_v47 = vrot.slane %v620_v56, 1  ;;  %v735_v23 = vmul.f32 0.125, %v719_v30  ;;  %v894_v46 = vrot.slane %v842_v31, 1 }
 0x19d   :  { %v736_v53 = vmul.f32 0.125, %v720_v10  ;;  %v843_v24 = vmul.f32 0.375, %v819_v43  ;;  %v569_v52 = vpop.permute.xlu1 %568  ;;  %v567_v29 = vpop.permute.xlu0 %566  ;;  %v823_v38 = vadd.f32 %v766_v51, %v621_v37  ;;  %v676_v39 = vsel %vm658_vm3, %v674_v61, %v675_v16 }
 0x19e   :  { %v897_v32 = vrot.slane %v844_v62, 1  ;;  %v678_v14 = vsel %vm658_vm3, %v675_v16, %v677_v15  ;;  %v721_v45 = vadd.f32 %v676_v39, %v619_v26  ;;  %v765_v17 = vsel %vm747_vm4, %v763_v12, %v764_v47 }
 0x19f   :  { %v895_v44 = vrot.slane %v843_v24, 1  ;;  %v680_v48 = vrot.slane %v1471_v42, 3  ;;  %v847_v25 = vmul.f32 0.375, %v823_v38  ;;  %v767_v49 = vsel %vm747_vm4, %v764_v47, %v766_v51 }
 0x1a0   :  { %v821_v60 = vadd.f32 %v765_v17, %v619_v26  ;;  %v622_v4 = vadd.f32 %v563_v11, %v1413_v63  ;;  %v722_v3 = vadd.f32 %v678_v14, %v620_v56  ;;  %v769_v7 = vrot.slane %v1471_v42, 1 }
 0x1a1   :  { %v896_v2 = vsel %vm747_vm4, %v894_v46, %v895_v44  ;;  %v898_v5 = vsel %vm747_vm4, %v895_v44, %v897_v32  ;;  %v573_v13 = vpop.permute.xlu1 %572  ;;  %v571_v19 = vpop.permute.xlu0 %570  ;;  %v1482_v8 = vmul.f32 0.125, %v369_v40  ;;  %v822_v1 = vadd.f32 %v767_v49, %v620_v56 }
 0x1a2   :  { %v944_v58 = vadd.f32 %v896_v2, %v735_v23  ;;  %v945_v35 = vadd.f32 %v898_v5, %v736_v53  ;;  %v737_v50 = vmul.f32 0.125, %v721_v45  ;;  %v845_v61 = vmul.f32 0.375, %v821_v60 }
 0x1a3   :  { %v679_v54 = vrot.slane %v622_v4, 3  ;;  %v768_v26 = vrot.slane %v622_v4, 1  ;;  %v902_v63 = vrot.slane %v847_v25, 1  ;;  %v846_v0 = vmul.f32 0.375, %v822_v1 }
 0x1a4   :  { %961 = vst.msk [vmem:[#allocation5 + $0x20] sm:$0xff] %vm956_vm5, %v944_v58  ;;  %962 = vst.msk [vmem:[#allocation5 + $0x28] sm:$0xff] %vm956_vm5, %v945_v35  ;;  %v624_v6 = vadd.f32 %v567_v29, %v1421_v20  ;;  %v627_v55 = vadd.f32 %v573_v13, %v1429_v27  ;;  %v738_v30 = vmul.f32 0.125, %v722_v3  ;;  %v899_v40 = vrot.slane %v845_v61, 1 }
 0x1a5   :  { %v681_v31 = vsel %vm658_vm3, %v679_v54, %v680_v48  ;;  %v770_v37 = vsel %vm747_vm4, %v768_v26, %v769_v7  ;;  %v577_v56 = vpop.permute.xlu1 %576  ;;  %v900_v57 = vrot.slane %v846_v0, 1  ;;  %v625_v12 = vadd.f32 %v569_v52, %v1423_v21  ;;  %v575_v20 = vpop.permute.xlu0 %574 }
 0x1a6   :  { %v824_v11 = vadd.f32 %v770_v37, %v622_v4  ;;  %v626_v9 = vadd.f32 %v571_v19, %v1425_v22  ;;  %v723_v36 = vadd.f32 %v681_v31, %v622_v4  ;;  %v682_v18 = vrot.slane %v624_v6, 3 }
 0x1a7   :  { %v771_v10 = vrot.slane %v624_v6, 1  ;;  %v776_v43 = vrot.slane %v627_v55, 1  ;;  %v901_v27 = vsel %vm747_vm4, %v899_v40, %v900_v57  ;;  %v903_v15 = vsel %vm747_vm4, %v900_v57, %v902_v63 }
 0x1a8   :  { %v848_v62 = vmul.f32 0.375, %v824_v11  ;;  %v687_v51 = vrot.slane %v627_v55, 3  ;;  %v946_v16 = vadd.f32 %v901_v27, %v737_v50  ;;  %v947_v47 = vadd.f32 %v903_v15, %v738_v30 }
 0x1a9   :  { %v683_v23 = vsel %vm658_vm3, %v680_v48, %v682_v18  ;;  %v772_v46 = vsel %vm747_vm4, %v769_v7, %v771_v10  ;;  %v684_v21 = vrot.slane %v625_v12, 3  ;;  %v773_v53 = vrot.slane %v625_v12, 1  ;;  %v581_v52 = vpop.permute.xlu1 %580  ;;  %v579_v4 = vpop.permute.xlu0 %578 }
 0x1aa   :  { %v825_v22 = vadd.f32 %v772_v46, %v1471_v42  ;;  %v826_v24 = vadd.f32 %v771_v10, %v624_v6  ;;  %963 = vst.msk [vmem:[#allocation5 + $0x30] sm:$0xff] %vm956_vm5, %v946_v16  ;;  %964 = vst.msk [vmem:[#allocation5 + $0x38] sm:$0xff] %vm956_vm5, %v947_v47  ;;  %v724_v29 = vadd.f32 %v683_v23, %v1471_v42  ;;  %v685_v38 = vrot.slane %v626_v9, 3 }
 0x1ab   :  { %v829_v32 = vadd.f32 %v776_v43, %v627_v55  ;;  %v774_v39 = vrot.slane %v626_v9, 1  ;;  %v739_v14 = vmul.f32 0.125, %v723_v36  ;;  %v629_v17 = vadd.f32 %v577_v56, %v1433_v33 }
 0x1ac   :  { %v849_v44 = vmul.f32 0.375, %v825_v22  ;;  %v850_v45 = vmul.f32 0.375, %v826_v24  ;;  %v904_v48 = vrot.slane %v848_v62, 1  ;;  %v686_v25 = vsel %vm658_vm3, %v684_v21, %v685_v38 }
 0x1ad   :  { %v688_v49 = vsel %vm658_vm3, %v685_v38, %v687_v51  ;;  %v775_v60 = vsel %vm747_vm4, %v773_v53, %v774_v39  ;;  %v853_v3 = vmul.f32 0.375, %v829_v32  ;;  %v628_v42 = vadd.f32 %v575_v20, %v1431_v28  ;;  %v585_v61 = vpop.permute.xlu1 %584  ;;  %v583_v57 = vpop.permute.xlu0 %582 }
 0x1ae   :  { %v905_v2 = vrot.slane %v849_v44, 1  ;;  %v907_v5 = vrot.slane %v850_v45, 1  ;;  %v740_v7 = vmul.f32 0.125, %v724_v29  ;;  %v725_v13 = vadd.f32 %v686_v25, %v625_v12 }
 0x1af   :  { %v777_v19 = vsel %vm747_vm4, %v774_v39, %v776_v43  ;;  %v827_v58 = vadd.f32 %v775_v60, %v625_v12  ;;  %v726_v1 = vadd.f32 %v688_v49, %v626_v9  ;;  %v690_v50 = vrot.slane %v629_v17, 3 }
 0x1b0   :  { %v906_v33 = vsel %vm747_vm4, %v904_v48, %v905_v2  ;;  %v908_v35 = vsel %vm747_vm4, %v905_v2, %v907_v5  ;;  %v828_v63 = vadd.f32 %v777_v19, %v626_v9  ;;  %v912_v6 = vrot.slane %v853_v3, 1 }
 0x1b1   :  { %v948_v54 = vadd.f32 %v906_v33, %v739_v14  ;;  %v949_v26 = vadd.f32 %v908_v35, %v740_v7  ;;  %v851_v0 = vmul.f32 0.375, %v827_v58  ;;  %v779_v55 = vrot.slane %v629_v17, 1 }
 0x1b2   :  { %v689_v30 = vrot.slane %v628_v42, 3  ;;  %v778_v28 = vrot.slane %v628_v42, 1  ;;  %v852_v40 = vmul.f32 0.375, %v828_v63  ;;  %v630_v37 = vadd.f32 %v579_v4, %v1435_v34 }
 0x1b3   :  { %965 = vst.msk [vmem:[#allocation5 + $0x40] sm:$0xff] %vm956_vm5, %v948_v54  ;;  %966 = vst.msk [vmem:[#allocation5 + $0x48] sm:$0xff] %vm956_vm5, %v949_v26  ;;  %v909_v31 = vrot.slane %v851_v0, 1  ;;  %v633_v56 = vadd.f32 %v585_v61, %v1482_v8  ;;  %v392_v11 = vmul.f32 0.125, %v1440_v41  ;;  %v741_v12 = vmul.f32 0.125, %v725_v13 }
 0x1b4   :  { %v691_v9 = vsel %vm658_vm3, %v689_v30, %v690_v50  ;;  %v780_v36 = vsel %vm747_vm4, %v778_v28, %v779_v55  ;;  %v910_v18 = vrot.slane %v852_v40, 1  ;;  %v631_v43 = vadd.f32 %v581_v52, %v1452_v59 }
 0x1b5   :  { %v830_v10 = vadd.f32 %v780_v36, %v628_v42  ;;  %v692_v20 = vrot.slane %v630_v37, 3  ;;  %v742_v27 = vmul.f32 0.125, %v726_v1  ;;  %v781_v15 = vrot.slane %v630_v37, 1 }
 0x1b6   :  { %v786_v62 = vrot.slane %v633_v56, 1  ;;  %v632_v51 = vadd.f32 %v583_v57, %v392_v11  ;;  %v911_v34 = vsel %vm747_vm4, %v909_v31, %v910_v18  ;;  %v913_v8 = vsel %vm747_vm4, %v910_v18, %v912_v6 }
 0x1b7   :  { %v727_v16 = vadd.f32 %v691_v9, %v628_v42  ;;  %v854_v41 = vmul.f32 0.375, %v830_v10  ;;  %v950_v47 = vadd.f32 %v911_v34, %v741_v12  ;;  %v951_v23 = vadd.f32 %v913_v8, %v742_v27 }
 0x1b8   :  { %v693_v46 = vsel %vm658_vm3, %v690_v50, %v692_v20  ;;  %v782_v21 = vsel %vm747_vm4, %v779_v55, %v781_v15  ;;  %v783_v53 = vrot.slane %v631_v43, 1  ;;  %v832_v24 = vadd.f32 %v781_v15, %v630_v37 }
 0x1b9   :  { %v728_v22 = vadd.f32 %v693_v46, %v629_v17  ;;  %v831_v59 = vadd.f32 %v782_v21, %v629_v17  ;;  %967 = vst.msk [vmem:[#allocation5 + $0x50] sm:$0xff] %vm956_vm5, %v950_v47  ;;  %968 = vst.msk [vmem:[#allocation5 + $0x58] sm:$0xff] %vm956_vm5, %v951_v23  ;;  %v697_v52 = vrot.slane %v633_v56, 3  ;;  %v835_v29 = vadd.f32 %v786_v62, %v633_v56 }
 0x1ba   :  { %v695_v32 = vrot.slane %v632_v51, 3  ;;  %v784_v38 = vrot.slane %v632_v51, 1  ;;  %v856_v14 = vmul.f32 0.375, %v832_v24  ;;  %v743_v44 = vmul.f32 0.125, %v727_v16 }
 0x1bb   :  { %v855_v39 = vmul.f32 0.375, %v831_v59  ;;  %v914_v45 = vrot.slane %v854_v41, 1  ;;  %v694_v48 = vrot.slane %v631_v43, 3  ;;  %v744_v49 = vmul.f32 0.125, %v728_v22 }
 0x1bc   :  { %v785_v25 = vsel %vm747_vm4, %v783_v53, %v784_v38  ;;  %v917_v4 = vrot.slane %v856_v14, 1  ;;  %v859_v17 = vmul.f32 0.375, %v835_v29  ;;  %v698_v5 = vsel %vm658_vm3, %v695_v32, %v697_v52 }
 0x1bd   :  { %v915_v60 = vrot.slane %v855_v39, 1  ;;  %v696_v2 = vsel %vm658_vm3, %v694_v48, %v695_v32  ;;  %v787_v3 = vsel %vm747_vm4, %v784_v38, %v786_v62  ;;  %v833_v42 = vadd.f32 %v785_v25, %v631_v43 }
 0x1be   :  { %v834_v33 = vadd.f32 %v787_v3, %v632_v51  ;;  %v729_v1 = vadd.f32 %v696_v2, %v631_v43  ;;  %v730_v50 = vadd.f32 %v698_v5, %v632_v51  ;;  %v922_v61 = vrot.slane %v859_v17, 1 }
 0x1bf   :  { %v916_v7 = vsel %vm747_vm4, %v914_v45, %v915_v60  ;;  %v918_v13 = vsel %vm747_vm4, %v915_v60, %v917_v4  ;;  %v857_v35 = vmul.f32 0.375, %v833_v42 }
 0x1c0   :  { %v952_v19 = vadd.f32 %v916_v7, %v743_v44  ;;  %v953_v58 = vadd.f32 %v918_v13, %v744_v49  ;;  %v858_v54 = vmul.f32 0.375, %v834_v33  ;;  %v745_v0 = vmul.f32 0.125, %v729_v1 }
 0x1c1   :  { %v919_v26 = vrot.slane %v857_v35, 1  ;;  %v746_v6 = vmul.f32 0.125, %v730_v50 }
 0x1c2   :  { %969 = vst.msk [vmem:[#allocation5 + $0x60] sm:$0xff] %vm956_vm5, %v952_v19  ;;  %970 = vst.msk [vmem:[#allocation5 + $0x68] sm:$0xff] %vm956_vm5, %v953_v58  ;;  %v920_v63 = vrot.slane %v858_v54, 1 }
 0x1c4   :  { %v921_v55 = vsel %vm747_vm4, %v919_v26, %v920_v63  ;;  %v923_v30 = vsel %vm747_vm4, %v920_v63, %v922_v61 }
 0x1c5   :  { %v954_v28 = vadd.f32 %v921_v55, %v745_v0  ;;  %v955_v40 = vadd.f32 %v923_v30, %v746_v6 }
 0x1c7   :  { %971 = vst.msk [vmem:[#allocation5 + $0x70] sm:$0xff] %vm956_vm5, %v954_v28  ;;  %972 = vst.msk [vmem:[#allocation5 + $0x78] sm:$0xff] %vm956_vm5, %v955_v40 }
 0x1c8   :  { %1030 = shalt.err (!%p1027_p12)
}
 0x1c9   :  { %s1031_s27 = scalar_lea.hbm %s1550_s1, 2048 }
 0x1ca   :  { %p1032_p13 = scmp.ne.s32.totalorder %s1550_s1, %s1031_s27  ;;  %p1035_p0 = scmp.lt.u32.totalorder %s1031_s27, %s1550_s1 }
 0x1cc   :  { %p1037_p1 = pnand %p1035_p0, %p1032_p13 }
 0x1ce   :  { %1040 = shalt.err (!%p1037_p1)
}
 0x1cf   :  { %984 = dma.vmem_to_hbm [thread:$0]  %s979_s23, 2048, %s1550_s1, [#allocation4], %s1046_s16, %s1046_s16, %s1047_s17  }
 0x1d0   :  { %1043 = dma.done.wait [#allocation4], 2048  }
 0x1d1   :  { %1044 = vsyncadd [#allocation4], 4294965248 }
 0x1d2   :  { %988 = vsyncpa [#allocation3], 1 }
 0x1d3   :  { %989 = vsyncpa [#allocation4], 1 }

</bundles_post_ra>
